<compile_context>
chip_gen: v7x
topology: tpu7x:2x2x1
jax: 0.10.0
libtpu: 0.0.40
codegen_flags: <defaults>
</compile_context>

<pallas_src>
import functools

import jax
import jax.numpy as jnp
from jax import lax
from jax.experimental import pallas as pl
from jax.experimental.pallas import tpu as pltpu

TEMPERATURE = 0.07
FILTER = 0.0  # module default `filter=0`


def _vmem_capacity_bytes():
    """Best-effort VMEM capacity query; falls back to the smallest (v7x) value."""
    try:
        info = pltpu.get_tpu_info()
        for attr in ("vmem_capacity_bytes", "vmem_bytes", "vmem_size_bytes"):
            v = getattr(info, attr, None)
            if v:
                return int(v)
    except Exception:
        pass
    return 64 * 1024 * 1024


def _budgets():
    """(vmem_limit_bytes, pass-1 plane cap, pass-2 plane cap) per device generation."""
    vmem = _vmem_capacity_bytes()
    if vmem >= 100 * 1024 * 1024:      # v5e / v6e: 128 MiB physical VMEM
        return 100 * 1024 * 1024, 12 * 1024 * 1024, 6 * 1024 * 1024
    # v7x (64 MiB VMEM per core): keep the conservative caps
    return 48 * 1024 * 1024, 6 * 1024 * 1024, 3 * 1024 * 1024


_VMEM_LIMIT, _P1_PLANE_CAP, _P2_PLANE_CAP = _budgets()


def _pick_tm(n_pad, plane_cap):
    """Largest row tile dividing n_pad whose (tm, n_pad) f32 plane fits plane_cap."""
    tm = 8
    for cand in (512, 256, 128, 64, 32, 16, 8):
        if n_pad % cand == 0 and cand * n_pad * 4 <= plane_cap:
            tm = cand
            break
    # Guarantee >= 2 grid steps so the "parallel" axis can split across v7x's 2 TCs.
    while n_pad // tm < 2 and tm > 8:
        tm //= 2
    return tm


def _row_sum(x):
    """Lane-axis reduction (exact f32).  An MXU mat-vec (x @ ones) is an
    alternative if a bundle dump shows the XLU/vex slot saturating; exact VPU/XLU
    reduction is kept here for strict numerical parity."""
    return jnp.sum(x, axis=1, keepdims=True)


def _stats_kernel(scores_ref, labc_ref, lsr_ref, rsc_ref, ecol_ref, scol_ref,
                  *, inv_t, tm, n_valid):
    """Pass 1: log row partition fn, per-row weight scale, partial column sums."""
    i = pl.program_id(0)
    s = scores_ref[...]                                    # (TM, Npad) f32
    lab_i = labc_ref[...]                                  # (TM, 1)

    gc = lax.broadcasted_iota(jnp.int32, s.shape, 1)       # column index (only full iota)
    row_idx = i * tm + lax.broadcasted_iota(jnp.int32, (tm, 1), 0)

    e = jnp.exp(s * inv_t)                                 # the only N^2 transcendental
    if n_valid != s.shape[1]:
        # Padded rows/cols must not contribute to the partition functions.
        valid = (gc < n_valid) & (row_idx < n_valid)
        e = jnp.where(valid, e, 0.0)

    lsr_ref[...] = jnp.log(jnp.maximum(_row_sum(e), 1e-30))  # (TM,1) log sum_row

    eye = gc == row_idx
    sim = jnp.where(eye, 0.0, s)                           # diag-zeroed similarity
    srow = _row_sum(sim)                                   # (TM, 1)
    # Fold (1 - label_i) / (srow + 1e-6) here (pass 1 has idle VALU); exact divide
    # on an N-length vector is free and matches the reference bit-for-bit closer.
    rsc_ref[...] = (1.0 - lab_i) / (srow + 1e-6)

    ecol_ref[0] = jnp.sum(e, axis=0, keepdims=True)        # (1, Npad) partial col sum
    scol_ref[0] = jnp.sum(sim, axis=0, keepdims=True)      # (1, Npad) partial col sum


def _loss_kernel(scores_ref, lsr_ref, rsc_ref, logsc_ref, csc_ref, labr_ref,
                 losspart_ref, rowmax_ref, colmax_ref, *, inv_t, filt, tm):
    """Pass 2: weighted soft-label loss + diff row/column maxima for one row tile."""
    i = pl.program_id(0)
    s = scores_ref[...]                                    # (TM, Npad)
    st = s * inv_t

    # -log(exp(s/T)/Z) == log(Z) - s/T    (no N^2 log / divide)
    loss_text = lsr_ref[...] - st                          # (TM, Npad)
    loss_img = logsc_ref[...] - st                         # (TM, Npad)

    gc = lax.broadcasted_iota(jnp.int32, s.shape, 1)
    row_idx = i * tm + lax.broadcasted_iota(jnp.int32, (tm, 1), 0)
    eye = gc == row_idx
    sim = jnp.where(eye, 0.0, s)

    # Reassociated: the (1-label)/sum factors were precombined into per-row /
    # per-column scales, so each weight is a single full-tile multiply.
    w_row = sim * rsc_ref[...]                             # (TM, Npad)
    w_col = sim * csc_ref[...]                             # (TM, Npad)
    if filt == 0.0:
        w_row = jnp.maximum(w_row, 0.0)                    # == where(w < 0, 0, w)
        w_col = jnp.maximum(w_col, 0.0)
    else:
        w_row = jnp.where(w_row < filt, 0.0, w_row)
        w_col = jnp.where(w_col < filt, 0.0, w_col)

    diff = w_row + w_col                                   # positive_weight cancels here
    rowmax_ref[...] = jnp.max(diff, axis=1, keepdims=True)
    colmax_ref[0] = jnp.max(diff, axis=0, keepdims=True)

    pos_w = jnp.where(eye, labr_ref[...], 0.0)             # diagonal soft labels
    combined = loss_text * (w_row + pos_w) + loss_img * (w_col + pos_w)
    losspart_ref[...] = _row_sum(combined)                 # (TM, 1) per-row loss sums


@jax.jit
def infonce_loss(scores, labels):
    """scores: (N, N) float; labels: (N, 1) float (same layout as the torch call)."""
    scores = scores.astype(jnp.float32)
    n = scores.shape[0]
    lab = labels[:, 0].astype(jnp.float32)                 # torch: labels.t()[0]

    # Pad to a multiple of 128 lanes.  Zero padding is exactly neutral for the
    # similarity path; the exp path is masked in pass 1.
    n_pad = max(128, ((n + 127) // 128) * 128)
    pad = n_pad - n
    if pad:
        scores = jnp.pad(scores, ((0, pad), (0, pad)))
        lab = jnp.pad(lab, (0, pad))
    lab_col = lab.reshape(n_pad, 1)
    lab_row = lab.reshape(1, n_pad)

    inv_t = 1.0 / TEMPERATURE
    cparams = pltpu.CompilerParams(
        dimension_semantics=("parallel",),
        vmem_limit_bytes=_VMEM_LIMIT,
    )

    # ---- Pass 1: row partition functions, per-row scale, partial column stats ----
    tm1 = _pick_tm(n_pad, _P1_PLANE_CAP)
    nt1 = n_pad // tm1

    lsr, row_scale, ecol_part, scol_part = pl.pallas_call(
        functools.partial(_stats_kernel, inv_t=inv_t, tm=tm1, n_valid=n),
        grid=(nt1,),
        in_specs=[
            pl.BlockSpec((tm1, n_pad), lambda i: (i, 0)),
            pl.BlockSpec((tm1, 1), lambda i: (i, 0)),
        ],
        out_specs=(
            pl.BlockSpec((tm1, 1), lambda i: (i, 0)),
            pl.BlockSpec((tm1, 1), lambda i: (i, 0)),
            pl.BlockSpec((1, 1, n_pad), lambda i: (i, 0, 0)),
            pl.BlockSpec((1, 1, n_pad), lambda i: (i, 0, 0)),
        ),
        out_shape=(
            jax.ShapeDtypeStruct((n_pad, 1), jnp.float32),
            jax.ShapeDtypeStruct((n_pad, 1), jnp.float32),
            jax.ShapeDtypeStruct((nt1, 1, n_pad), jnp.float32),
            jax.ShapeDtypeStruct((nt1, 1, n_pad), jnp.float32),
        ),
        compiler_params=cparams,
    )(scores, lab_col)

    # Grid-invariant (1, Npad) math hoisted out of the VALU-bound pass 2.
    sum_col = jnp.sum(ecol_part, axis=0)                   # (1, Npad) col partition fn
    scol = jnp.sum(scol_part, axis=0)                      # (1, Npad) col sums of sim
    logsc = jnp.log(jnp.maximum(sum_col, 1e-30))
    col_scale = (1.0 - lab_row) / (scol + 1e-6)

    # ---- Pass 2: weighted loss + row/column maxima of the weight matrix ----
    tm2 = _pick_tm(n_pad, _P2_PLANE_CAP)
    nt2 = n_pad // tm2

    losspart, rowmax, colmax_part = pl.pallas_call(
        functools.partial(_loss_kernel, inv_t=inv_t, filt=FILTER, tm=tm2),
        grid=(nt2,),
        in_specs=[
            pl.BlockSpec((tm2, n_pad), lambda i: (i, 0)),
            pl.BlockSpec((tm2, 1), lambda i: (i, 0)),
            pl.BlockSpec((tm2, 1), lambda i: (i, 0)),
            pl.BlockSpec((1, n_pad), lambda i: (0, 0)),
            pl.BlockSpec((1, n_pad), lambda i: (0, 0)),
            pl.BlockSpec((1, n_pad), lambda i: (0, 0)),
        ],
        out_specs=(
            pl.BlockSpec((tm2, 1), lambda i: (i, 0)),
            pl.BlockSpec((tm2, 1), lambda i: (i, 0)),
            pl.BlockSpec((1, 1, n_pad), lambda i: (i, 0, 0)),
        ),
        out_shape=(
            jax.ShapeDtypeStruct((n_pad, 1), jnp.float32),
            jax.ShapeDtypeStruct((n_pad, 1), jnp.float32),
            jax.ShapeDtypeStruct((nt2, 1, n_pad), jnp.float32),
        ),
        compiler_params=cparams,
    )(scores, lsr, row_scale, logsc, col_scale, lab_row)

    # Padded rows/cols contribute exactly 0; slice back to the true N.
    total = jnp.sum(losspart[:n, 0]) / n
    m1 = jnp.mean(rowmax[:n, 0]) * 0.5
    colmax = jnp.max(colmax_part, axis=0)[0, :n]
    m2 = jnp.mean(colmax) * 0.5
    return total, m1, m2


def _reference(scores, labels):
    """Plain-JAX mirror of the PyTorch default path, for a sanity check."""
    n = scores.shape[0]
    lab = labels[:, 0]
    e = jnp.exp(scores / TEMPERATURE)
    sum_row = jnp.sum(e, axis=1, keepdims=True)
    sum_col = jnp.sum(e, axis=0, keepdims=True)
    loss_text = -jnp.log(e / sum_row)
    loss_img = -jnp.log(e / sum_col)
    eye = jnp.eye(n, dtype=bool)
    pos_w = jnp.where(eye, lab[None, :], 0.0)
    sim = jnp.where(eye, 0.0, scores)
    srow = jnp.sum(sim, axis=1, keepdims=True)
    scol = jnp.sum(sim, axis=0, keepdims=True)
    w_row = (1.0 - lab[:, None]) * (sim / (srow + 1e-6))
    w_col = (1.0 - lab[None, :]) * (sim / (scol + 1e-6))
    w_row = jnp.where(w_row < FILTER, 0.0, w_row) + pos_w
    w_col = jnp.where(w_col < FILTER, 0.0, w_col) + pos_w
    total = jnp.sum(loss_text * w_row + loss_img * w_col) / n
    diff = w_row + w_col - 2.0 * pos_w
    return total, jnp.mean(jnp.max(diff, axis=1)) / 2, jnp.mean(jnp.max(diff, axis=0)) / 2


if __name__ == "__main__":
    N = 8
    key = jax.random.PRNGKey(0)
    k_scores, k_labels = jax.random.split(key)
    # cosine-similarity-like scores in [-1, 1] and soft labels in [0, 1]
    scores = jax.random.uniform(k_scores, (N, N), jnp.float32, minval=-1.0, maxval=1.0)
    labels = jax.random.uniform(k_labels, (N, 1), jnp.float32)

    out = infonce_loss(scores, labels)
    out = jax.block_until_ready(out)

    ref = _reference(scores, labels)
    for got, exp in zip(out, ref):
        assert jnp.allclose(got, exp, rtol=2e-3, atol=2e-3), (got, exp)

    print("KERNEL_OK")
</pallas_src>

<mosaic_0001>
module attributes {stable_mosaic.version = 11 : i64} {
  func.func @_stats_kernel(%arg0: i32, %arg1: memref<64x128xf32, #tpu.memory_space<vmem>>, %arg2: memref<64x1xf32, #tpu.memory_space<vmem>>, %arg3: memref<64x1xf32, #tpu.memory_space<vmem>>, %arg4: memref<64x1xf32, #tpu.memory_space<vmem>>, %arg5: memref<1x1x128xf32, #tpu.memory_space<vmem>>, %arg6: memref<1x1x128xf32, #tpu.memory_space<vmem>>) attributes {dimension_semantics = [#tpu.dimension_semantics<parallel>], iteration_bounds = array<i64: 2>, scalar_prefetch = 0 : i64, scratch_operands = 0 : i64, tpu.core_type = #tpu.core_type<tc>, window_params = [{transform_indices = @transform_0, window_bounds = array<i64: 64, 128>}, {transform_indices = @transform_1, window_bounds = array<i64: 64, 1>}, {transform_indices = @transform_2, window_bounds = array<i64: 64, 1>}, {transform_indices = @transform_3, window_bounds = array<i64: 64, 1>}, {transform_indices = @transform_4, window_bounds = array<i64: 1, 1, 128>}, {transform_indices = @transform_5, window_bounds = array<i64: 1, 1, 128>}]} {
    %c0 = arith.constant 0 : index
    %c0_0 = arith.constant 0 : index
    %0 = vector.load %arg1[%c0, %c0_0] : memref<64x128xf32, #tpu.memory_space<vmem>>, vector<64x128xf32>
    %c0_1 = arith.constant 0 : index
    %c0_2 = arith.constant 0 : index
    %1 = vector.load %arg2[%c0_1, %c0_2] : memref<64x1xf32, #tpu.memory_space<vmem>>, vector<64x1xf32>
    %2 = tpu.iota {dimensions = array<i32: 1>} : vector<64x128xi32>
    %c64_i32 = arith.constant 64 : i32
    %3 = arith.muli %arg0, %c64_i32 : i32
    %4 = tpu.iota {dimensions = array<i32: 0>} : vector<64x1xi32>
    %5 = vector.broadcast %3 : i32 to vector<64x1xi32>
    %6 = arith.addi %5, %4 : vector<64x1xi32>
    %cst = arith.constant 14.2857141 : f32
    %7 = vector.broadcast %cst : f32 to vector<64x128xf32>
    %8 = arith.mulf %0, %7 : vector<64x128xf32>
    %9 = math.exp %8 : vector<64x128xf32>
    %c8_i32 = arith.constant 8 : i32
    %10 = vector.broadcast %c8_i32 : i32 to vector<64x128xi32>
    %11 = arith.cmpi slt, %2, %10 : vector<64x128xi32>
    %c8_i32_3 = arith.constant 8 : i32
    %12 = vector.broadcast %c8_i32_3 : i32 to vector<64x1xi32>
    %13 = arith.cmpi slt, %6, %12 : vector<64x1xi32>
    %14 = vector.broadcast %13 : vector<64x1xi1> to vector<64x128xi1>
    %15 = arith.andi %11, %14 : vector<64x128xi1>
    %cst_4 = arith.constant 0.000000e+00 : f32
    %16 = vector.broadcast %cst_4 : f32 to vector<64x128xf32>
    %17 = arith.select %15, %9, %16 : vector<64x128xi1>, vector<64x128xf32>
    %cst_5 = arith.constant dense<0.000000e+00> : vector<64xf32>
    %18 = vector.multi_reduction <add>, %17, %cst_5 [1] : vector<64x128xf32> to vector<64xf32>
    %19 = vector.shape_cast %18 : vector<64xf32> to vector<64x1xf32>
    %cst_6 = arith.constant 1.000000e-30 : f32
    %20 = vector.broadcast %cst_6 : f32 to vector<64x1xf32>
    %21 = arith.maximumf %19, %20 : vector<64x1xf32>
    %22 = math.log %21 : vector<64x1xf32>
    %c0_7 = arith.constant 0 : index
    %c0_8 = arith.constant 0 : index
    %23 = vector.load %arg3[%c0_7, %c0_8] : memref<64x1xf32, #tpu.memory_space<vmem>>, vector<64x1xf32>
    tpu.vector_store %arg3[%c0_7, %c0_8], %22 {strides = array<i32>} : memref<64x1xf32, #tpu.memory_space<vmem>>, vector<64x1xf32>,
    %24 = vector.broadcast %6 : vector<64x1xi32> to vector<64x128xi32>
    %25 = arith.cmpi eq, %2, %24 : vector<64x128xi32>
    %cst_9 = arith.constant 0.000000e+00 : f32
    %26 = vector.broadcast %cst_9 : f32 to vector<64x128xf32>
    %27 = arith.select %25, %26, %0 : vector<64x128xi1>, vector<64x128xf32>
    %cst_10 = arith.constant dense<0.000000e+00> : vector<64xf32>
    %28 = vector.multi_reduction <add>, %27, %cst_10 [1] : vector<64x128xf32> to vector<64xf32>
    %29 = vector.shape_cast %28 : vector<64xf32> to vector<64x1xf32>
    %cst_11 = arith.constant 1.000000e+00 : f32
    %30 = vector.broadcast %cst_11 : f32 to vector<64x1xf32>
    %31 = arith.subf %30, %1 : vector<64x1xf32>
    %cst_12 = arith.constant 9.99999997E-7 : f32
    %32 = vector.broadcast %cst_12 : f32 to vector<64x1xf32>
    %33 = arith.addf %29, %32 : vector<64x1xf32>
    %34 = arith.divf %31, %33 : vector<64x1xf32>
    %c0_13 = arith.constant 0 : index
    %c0_14 = arith.constant 0 : index
    %35 = vector.load %arg4[%c0_13, %c0_14] : memref<64x1xf32, #tpu.memory_space<vmem>>, vector<64x1xf32>
    tpu.vector_store %arg4[%c0_13, %c0_14], %34 {strides = array<i32>} : memref<64x1xf32, #tpu.memory_space<vmem>>, vector<64x1xf32>,
    %cst_15 = arith.constant dense<0.000000e+00> : vector<128xf32>
    %36 = vector.multi_reduction <add>, %17, %cst_15 [0] : vector<64x128xf32> to vector<128xf32>
    %37 = vector.shape_cast %36 : vector<128xf32> to vector<1x128xf32>
    %c0_16 = arith.constant 0 : index
    %c0_17 = arith.constant 0 : index
    %c0_18 = arith.constant 0 : index
    %38 = vector.load %arg5[%c0_16, %c0_17, %c0_18] : memref<1x1x128xf32, #tpu.memory_space<vmem>>, vector<1x1x128xf32>
    %39 = vector.shape_cast %38 : vector<1x1x128xf32> to vector<1x128xf32>
    %40 = vector.shape_cast %37 : vector<1x128xf32> to vector<1x1x128xf32>
    tpu.vector_store %arg5[%c0_16, %c0_17, %c0_18], %40 {strides = array<i32>} : memref<1x1x128xf32, #tpu.memory_space<vmem>>, vector<1x1x128xf32>,
    %cst_19 = arith.constant dense<0.000000e+00> : vector<128xf32>
    %41 = vector.multi_reduction <add>, %27, %cst_19 [0] : vector<64x128xf32> to vector<128xf32>
    %42 = vector.shape_cast %41 : vector<128xf32> to vector<1x128xf32>
    %c0_20 = arith.constant 0 : index
    %c0_21 = arith.constant 0 : index
    %c0_22 = arith.constant 0 : index
    %43 = vector.load %arg6[%c0_20, %c0_21, %c0_22] : memref<1x1x128xf32, #tpu.memory_space<vmem>>, vector<1x1x128xf32>
    %44 = vector.shape_cast %43 : vector<1x1x128xf32> to vector<1x128xf32>
    %45 = vector.shape_cast %42 : vector<1x128xf32> to vector<1x1x128xf32>
    tpu.vector_store %arg6[%c0_20, %c0_21, %c0_22], %45 {strides = array<i32>} : memref<1x1x128xf32, #tpu.memory_space<vmem>>, vector<1x1x128xf32>,
    return
  }
  func.func @transform_0(%arg0: i32) -> (i32, i32) {
    %c0_i32 = arith.constant 0 : i32
    %c0_i32_0 = arith.constant 0 : i32
    return %arg0, %c0_i32 : i32, i32
  }
  func.func @transform_1(%arg0: i32) -> (i32, i32) {
    %c0_i32 = arith.constant 0 : i32
    %c0_i32_0 = arith.constant 0 : i32
    return %arg0, %c0_i32 : i32, i32
  }
  func.func @transform_2(%arg0: i32) -> (i32, i32) {
    %c0_i32 = arith.constant 0 : i32
    %c0_i32_0 = arith.constant 0 : i32
    return %arg0, %c0_i32 : i32, i32
  }
  func.func @transform_3(%arg0: i32) -> (i32, i32) {
    %c0_i32 = arith.constant 0 : i32
    %c0_i32_0 = arith.constant 0 : i32
    return %arg0, %c0_i32 : i32, i32
  }
  func.func @transform_4(%arg0: i32) -> (i32, i32, i32) {
    %c0_i32 = arith.constant 0 : i32
    %c0_i32_0 = arith.constant 0 : i32
    %c0_i32_1 = arith.constant 0 : i32
    return %arg0, %c0_i32, %c0_i32_0 : i32, i32, i32
  }
  func.func @transform_5(%arg0: i32) -> (i32, i32, i32) {
    %c0_i32 = arith.constant 0 : i32
    %c0_i32_0 = arith.constant 0 : i32
    %c0_i32_1 = arith.constant 0 : i32
    return %arg0, %c0_i32, %c0_i32_0 : i32, i32, i32
  }
}

module attributes {stable_mosaic.version = 11 : i64} {
  func.func @_loss_kernel(%arg0: i32, %arg1: memref<64x128xf32, #tpu.memory_space<vmem>>, %arg2: memref<64x1xf32, #tpu.memory_space<vmem>>, %arg3: memref<64x1xf32, #tpu.memory_space<vmem>>, %arg4: memref<1x128xf32, #tpu.memory_space<vmem>>, %arg5: memref<1x128xf32, #tpu.memory_space<vmem>>, %arg6: memref<1x128xf32, #tpu.memory_space<vmem>>, %arg7: memref<64x1xf32, #tpu.memory_space<vmem>>, %arg8: memref<64x1xf32, #tpu.memory_space<vmem>>, %arg9: memref<1x1x128xf32, #tpu.memory_space<vmem>>) attributes {dimension_semantics = [#tpu.dimension_semantics<parallel>], iteration_bounds = array<i64: 2>, scalar_prefetch = 0 : i64, scratch_operands = 0 : i64, tpu.core_type = #tpu.core_type<tc>, window_params = [{transform_indices = @transform_0, window_bounds = array<i64: 64, 128>}, {transform_indices = @transform_1, window_bounds = array<i64: 64, 1>}, {transform_indices = @transform_2, window_bounds = array<i64: 64, 1>}, {pipeline_mode = #tpu.pipeline_mode<synchronous>, transform_indices = @transform_3, window_bounds = array<i64: 1, 128>}, {pipeline_mode = #tpu.pipeline_mode<synchronous>, transform_indices = @transform_4, window_bounds = array<i64: 1, 128>}, {pipeline_mode = #tpu.pipeline_mode<synchronous>, transform_indices = @transform_5, window_bounds = array<i64: 1, 128>}, {transform_indices = @transform_6, window_bounds = array<i64: 64, 1>}, {transform_indices = @transform_7, window_bounds = array<i64: 64, 1>}, {transform_indices = @transform_8, window_bounds = array<i64: 1, 1, 128>}]} {
    %c0 = arith.constant 0 : index
    %c0_0 = arith.constant 0 : index
    %0 = vector.load %arg1[%c0, %c0_0] : memref<64x128xf32, #tpu.memory_space<vmem>>, vector<64x128xf32>
    %cst = arith.constant 14.2857141 : f32
    %1 = vector.broadcast %cst : f32 to vector<64x128xf32>
    %2 = arith.mulf %0, %1 : vector<64x128xf32>
    %c0_1 = arith.constant 0 : index
    %c0_2 = arith.constant 0 : index
    %3 = vector.load %arg2[%c0_1, %c0_2] : memref<64x1xf32, #tpu.memory_space<vmem>>, vector<64x1xf32>
    %4 = vector.broadcast %3 : vector<64x1xf32> to vector<64x128xf32>
    %5 = arith.subf %4, %2 : vector<64x128xf32>
    %c0_3 = arith.constant 0 : index
    %c0_4 = arith.constant 0 : index
    %6 = vector.load %arg4[%c0_3, %c0_4] : memref<1x128xf32, #tpu.memory_space<vmem>>, vector<1x128xf32>
    %7 = vector.broadcast %6 : vector<1x128xf32> to vector<64x128xf32>
    %8 = arith.subf %7, %2 : vector<64x128xf32>
    %9 = tpu.iota {dimensions = array<i32: 1>} : vector<64x128xi32>
    %c64_i32 = arith.constant 64 : i32
    %10 = arith.muli %arg0, %c64_i32 : i32
    %11 = tpu.iota {dimensions = array<i32: 0>} : vector<64x1xi32>
    %12 = vector.broadcast %10 : i32 to vector<64x1xi32>
    %13 = arith.addi %12, %11 : vector<64x1xi32>
    %14 = vector.broadcast %13 : vector<64x1xi32> to vector<64x128xi32>
    %15 = arith.cmpi eq, %9, %14 : vector<64x128xi32>
    %cst_5 = arith.constant 0.000000e+00 : f32
    %16 = vector.broadcast %cst_5 : f32 to vector<64x128xf32>
    %17 = arith.select %15, %16, %0 : vector<64x128xi1>, vector<64x128xf32>
    %c0_6 = arith.constant 0 : index
    %c0_7 = arith.constant 0 : index
    %18 = vector.load %arg3[%c0_6, %c0_7] : memref<64x1xf32, #tpu.memory_space<vmem>>, vector<64x1xf32>
    %19 = vector.broadcast %18 : vector<64x1xf32> to vector<64x128xf32>
    %20 = arith.mulf %17, %19 : vector<64x128xf32>
    %c0_8 = arith.constant 0 : index
    %c0_9 = arith.constant 0 : index
    %21 = vector.load %arg5[%c0_8, %c0_9] : memref<1x128xf32, #tpu.memory_space<vmem>>, vector<1x128xf32>
    %22 = vector.broadcast %21 : vector<1x128xf32> to vector<64x128xf32>
    %23 = arith.mulf %17, %22 : vector<64x128xf32>
    %cst_10 = arith.constant 0.000000e+00 : f32
    %24 = vector.broadcast %cst_10 : f32 to vector<64x128xf32>
    %25 = arith.maximumf %20, %24 : vector<64x128xf32>
    %cst_11 = arith.constant 0.000000e+00 : f32
    %26 = vector.broadcast %cst_11 : f32 to vector<64x128xf32>
    %27 = arith.maximumf %23, %26 : vector<64x128xf32>
    %28 = arith.addf %25, %27 : vector<64x128xf32>
    %cst_12 = arith.constant dense<0xFF800000> : vector<64xf32>
    %29 = vector.multi_reduction <maximumf>, %28, %cst_12 [1] : vector<64x128xf32> to vector<64xf32>
    %30 = vector.shape_cast %29 : vector<64xf32> to vector<64x1xf32>
    %c0_13 = arith.constant 0 : index
    %c0_14 = arith.constant 0 : index
    %31 = vector.load %arg8[%c0_13, %c0_14] : memref<64x1xf32, #tpu.memory_space<vmem>>, vector<64x1xf32>
    tpu.vector_store %arg8[%c0_13, %c0_14], %30 {strides = array<i32>} : memref<64x1xf32, #tpu.memory_space<vmem>>, vector<64x1xf32>,
    %cst_15 = arith.constant dense<0xFF800000> : vector<128xf32>
    %32 = vector.multi_reduction <maximumf>, %28, %cst_15 [0] : vector<64x128xf32> to vector<128xf32>
    %33 = vector.shape_cast %32 : vector<128xf32> to vector<1x128xf32>
    %c0_16 = arith.constant 0 : index
    %c0_17 = arith.constant 0 : index
    %c0_18 = arith.constant 0 : index
    %34 = vector.load %arg9[%c0_16, %c0_17, %c0_18] : memref<1x1x128xf32, #tpu.memory_space<vmem>>, vector<1x1x128xf32>
    %35 = vector.shape_cast %34 : vector<1x1x128xf32> to vector<1x128xf32>
    %36 = vector.shape_cast %33 : vector<1x128xf32> to vector<1x1x128xf32>
    tpu.vector_store %arg9[%c0_16, %c0_17, %c0_18], %36 {strides = array<i32>} : memref<1x1x128xf32, #tpu.memory_space<vmem>>, vector<1x1x128xf32>,
    %c0_19 = arith.constant 0 : index
    %c0_20 = arith.constant 0 : index
    %37 = vector.load %arg6[%c0_19, %c0_20] : memref<1x128xf32, #tpu.memory_space<vmem>>, vector<1x128xf32>
    %cst_21 = arith.constant 0.000000e+00 : f32
    %38 = vector.shape_cast %37 : vector<1x128xf32> to vector<1x128xf32>
    %39 = vector.broadcast %38 : vector<1x128xf32> to vector<64x128xf32>
    %40 = vector.broadcast %cst_21 : f32 to vector<64x128xf32>
    %41 = arith.select %15, %39, %40 : vector<64x128xi1>, vector<64x128xf32>
    %42 = arith.addf %25, %41 : vector<64x128xf32>
    %43 = arith.mulf %5, %42 : vector<64x128xf32>
    %44 = arith.addf %27, %41 : vector<64x128xf32>
    %45 = arith.mulf %8, %44 : vector<64x128xf32>
    %46 = arith.addf %43, %45 : vector<64x128xf32>
    %cst_22 = arith.constant dense<0.000000e+00> : vector<64xf32>
    %47 = vector.multi_reduction <add>, %46, %cst_22 [1] : vector<64x128xf32> to vector<64xf32>
    %48 = vector.shape_cast %47 : vector<64xf32> to vector<64x1xf32>
    %c0_23 = arith.constant 0 : index
    %c0_24 = arith.constant 0 : index
    %49 = vector.load %arg7[%c0_23, %c0_24] : memref<64x1xf32, #tpu.memory_space<vmem>>, vector<64x1xf32>
    tpu.vector_store %arg7[%c0_23, %c0_24], %48 {strides = array<i32>} : memref<64x1xf32, #tpu.memory_space<vmem>>, vector<64x1xf32>,
    return
  }
  func.func @transform_0(%arg0: i32) -> (i32, i32) {
    %c0_i32 = arith.constant 0 : i32
    %c0_i32_0 = arith.constant 0 : i32
    return %arg0, %c0_i32 : i32, i32
  }
  func.func @transform_1(%arg0: i32) -> (i32, i32) {
    %c0_i32 = arith.constant 0 : i32
    %c0_i32_0 = arith.constant 0 : i32
    return %arg0, %c0_i32 : i32, i32
  }
  func.func @transform_2(%arg0: i32) -> (i32, i32) {
    %c0_i32 = arith.constant 0 : i32
    %c0_i32_0 = arith.constant 0 : i32
    return %arg0, %c0_i32 : i32, i32
  }
  func.func @transform_3(%arg0: i32) -> (i32, i32) {
    %c0_i32 = arith.constant 0 : i32
    %c0_i32_0 = arith.constant 0 : i32
    %c0_i32_1 = arith.constant 0 : i32
    return %c0_i32, %c0_i32_0 : i32, i32
  }
  func.func @transform_4(%arg0: i32) -> (i32, i32) {
    %c0_i32 = arith.constant 0 : i32
    %c0_i32_0 = arith.constant 0 : i32
    %c0_i32_1 = arith.constant 0 : i32
    return %c0_i32, %c0_i32_0 : i32, i32
  }
  func.func @transform_5(%arg0: i32) -> (i32, i32) {
    %c0_i32 = arith.constant 0 : i32
    %c0_i32_0 = arith.constant 0 : i32
    %c0_i32_1 = arith.constant 0 : i32
    return %c0_i32, %c0_i32_0 : i32, i32
  }
  func.func @transform_6(%arg0: i32) -> (i32, i32) {
    %c0_i32 = arith.constant 0 : i32
    %c0_i32_0 = arith.constant 0 : i32
    return %arg0, %c0_i32 : i32, i32
  }
  func.func @transform_7(%arg0: i32) -> (i32, i32) {
    %c0_i32 = arith.constant 0 : i32
    %c0_i32_0 = arith.constant 0 : i32
    return %arg0, %c0_i32 : i32, i32
  }
  func.func @transform_8(%arg0: i32) -> (i32, i32, i32) {
    %c0_i32 = arith.constant 0 : i32
    %c0_i32_0 = arith.constant 0 : i32
    %c0_i32_1 = arith.constant 0 : i32
    return %arg0, %c0_i32, %c0_i32_0 : i32, i32, i32
  }
}

</mosaic_0001>

<bundles_post_ra>
// kernel: infonce_loss.2
= control target key start
LH: loop header
LB: loop body
LE: loop exit
PB: predicated region body
PF: predicated region fallthrough
CT: control target
= control target key end

     0   :  { %s793_s18 = smov 0   ;;  %s963_s0 = inlined_call_operand.vmem [shape: f32[128,128], index: 0, kind: input, shape index: {}]   ;;  %s964_s1 = inlined_call_operand.vmem [shape: f32[128,1], index: 1, kind: input, shape index: {}]   ;;  %s965_s2 = inlined_call_operand.vmem [shape: f32[128,1], index: 2, kind: output, shape index: {0}]   ;;  %s966_s3 = inlined_call_operand.vmem [shape: f32[128,1], index: 3, kind: output, shape index: {1}]   ;;  %s967_s4 = inlined_call_operand.vmem [shape: f32[2,1,128], index: 4, kind: output, shape index: {2}]   ;;  %s968_s5 = inlined_call_operand.vmem [shape: f32[2,1,128], index: 5, kind: output, shape index: {3}]  }
   0x1 LB: > { %s799_s19 = sadd.s32 4294967295, %s761_s18   ;;  %p687_p0 = scmp.ge.s32.totalorder %s761_s18, 1  ;;  %s761_s18 = sphi %s793_s18, %s16_s18  }
   0x2   : > { %p206_p1 = scmp.lt.s32.totalorder %s761_s18, 3 }
   0x4   : > { %p207_p2 = pnand %p687_p0, %p206_p1 }
   0x5   : > { %s688_s20 = sshll.u32 (!%p207_p2), %s799_s19, 3  ;;  %v296_v0 = vlaneseq (!%p207_p2)  ;;  %s696_s21 = sshll.u32 (!%p207_p2), %s799_s19, 6 }
   0x6   : > { %210 = sbr.rel (%p207_p2) target bundleno = 210 (0xd2), region = 28  ;;  %p251_p3 = scmp.lt.s32.totalorder (!%p207_p2), %s688_s20, 15  ;;  %v805_v1 = vstv (!%p207_p2), %s696_s21 }
   0x7   : > { %v807_v2 = vand.u32 (!%p207_p2), 127, %v296_v0  ;;  %v809_v3 = vshrl.u32 (!%p207_p2), %v296_v0, 7  ;;  %p274_p4 = scmp.lt.s32.totalorder (!%p207_p2), %s799_s19, 1 }
   0x9   : > { %v301_v4 = vadd.s32 (!%p207_p2), 8, %v809_v3  ;;  %v814_v5 = vadd.s32 (!%p207_p2), %v805_v1, %v809_v3  ;;  %v303_v6 = vadd.s32 (!%p207_p2), 24, %v809_v3  ;;  %v302_v7 = vadd.s32 (!%p207_p2), 16, %v809_v3 }
   0xa   : > { %v305_v8 = vadd.s32 (!%p207_p2), 40, %v809_v3  ;;  %v304_v9 = vadd.s32 (!%p207_p2), 32, %v809_v3  ;;  %v307_v37 = vadd.s32 (!%p207_p2), 56, %v809_v3  ;;  %vm341_vm6 = vcmp.lt.s32.totalorder (!%p207_p2), %v807_v2, 8 }
   0xb   : > { %v829_v10 = vadd.s32 (!%p207_p2), %v805_v1, %v301_v4  ;;  %vm431_vm0 = vcmp.eq.s32.totalorder (!%p207_p2), %v807_v2, %v814_v5  ;;  %v834_v11 = vadd.s32 (!%p207_p2), %v805_v1, %v303_v6  ;;  %v840_v15 = vadd.s32 (!%p207_p2), %v805_v1, %v302_v7 }
   0xc   : > { %v843_v16 = vadd.s32 (!%p207_p2), %v805_v1, %v305_v8  ;;  %v846_v17 = vadd.s32 (!%p207_p2), %v805_v1, %v304_v9  ;;  %vm342_vm7 = vcmp.lt.s32.totalorder (!%p207_p2), %v814_v5, 8  ;;  %v306_v47 = vadd.s32 (!%p207_p2), 48, %v809_v3 }
   0xd   : > { %s970_s20 = smov (!%p251_p3, %s688_s20), 15  ;;  %vm432_vm1 = vcmp.eq.s32.totalorder %v807_v2, %v829_v10  ;;  %vm434_vm2 = vcmp.eq.s32.totalorder %v807_v2, %v834_v11  ;;  %vm433_vm3 = vcmp.eq.s32.totalorder %v807_v2, %v840_v15  ;;  %vm343_vm8 = vcmp.lt.s32.totalorder %v829_v10, 8  ;;  %vm366_vm10 = vmand %vm341_vm6, %vm342_vm7  ;;  %s972_s19 = smov (!%p274_p4, %s799_s19), 1 }
   0xe   : > { %s818_s22 = sshll.u32 %s970_s20, 3  ;;  %vm436_vm4 = vcmp.eq.s32.totalorder %v807_v2, %v843_v16  ;;  %vm435_vm5 = vcmp.eq.s32.totalorder %v807_v2, %v846_v17  ;;  %v316_v49 = vadd.s32 %v805_v1, %v307_v37  ;;  %vm344_vm9 = vcmp.lt.s32.totalorder %v840_v15, 8  ;;  %vm367_vm11 = vmand %vm341_vm6, %vm343_vm8  ;;  %s279_s28 = scalar_lea.vmem %s968_s5, %s972_s19 }
   0xf   : > { %s826_s25 = scalar_lea.vmem %s963_s0, %s818_s22  ;;  %v315_v51 = vadd.s32 %v805_v1, %v306_v47  ;;  %vm345_vm12 = vcmp.lt.s32.totalorder %v834_v11, 8  ;;  %vm368_vm15 = vmand %vm341_vm6, %vm344_vm9  ;;  %s276_s6 = scalar_lea.vmem %s967_s4, %s972_s19 }
  0x10   : > { %v281_v12 = vld [vmem:[%s826_s25 + $0x8] sm:$0xff]  ;;  %v280_v13 = vld [vmem:[%s826_s25] sm:$0xff]  ;;  %v283_v14 = vld [vmem:[%s826_s25 + $0x18] sm:$0xff]  ;;  %vm438_vm13 = vcmp.eq.s32.totalorder %v807_v2, %v316_v49  ;;  %vm349_vm7 = vcmp.lt.s32.totalorder %v316_v49, 8  ;;  %s906_s9 = scalar_lea.vmem %s964_s1, %s818_s22  ;;  %s916_s12 = scalar_lea.vmem %s966_s3, %s818_s22 }
  0x11   : > { %v318_v18 = vmul.f32 14.285714, %v281_v12  ;;  %v439_v19 = vsel %vm431_vm0, 0.0, %v280_v13  ;;  %v317_v20 = vmul.f32 14.285714, %v280_v13  ;;  %v282_v21 = vld [vmem:[%s826_s25 + $0x10] sm:$0xff]  ;;  %vm437_vm14 = vcmp.eq.s32.totalorder %v807_v2, %v315_v51  ;;  %vm373_vm9 = vmand %vm341_vm6, %vm349_vm7  ;;  %s936_s15 = scalar_lea.vmem %s965_s2, %s818_s22 }
  0x12   : > { %v440_v22 = vsel %vm432_vm1, 0.0, %v281_v12  ;;  %447 = vadd.xlane.f32.xlu0 %v439_v19  ;;  %v320_v23 = vmul.f32 14.285714, %v283_v14  ;;  %v319_v24 = vmul.f32 14.285714, %v282_v21  ;;  %v285_v25 = vld [vmem:[%s826_s25 + $0x28] sm:$0xff]  ;;  %vm369_vm1 = vmand %vm341_vm6, %vm345_vm12 }
  0x13   : > { %449 = vadd.xlane.f32.xlu1 %v440_v22  ;;  %v327_v26 = vmul.f32 1.442695, %v318_v18  ;;  %v325_v27 = vmul.f32 1.442695, %v317_v20  ;;  %v517_v28 = vadd.f32 %v440_v22, %v439_v19  ;;  %v442_v29 = vsel %vm434_vm2, 0.0, %v283_v14  ;;  %v284_v30 = vld [vmem:[%s826_s25 + $0x20] sm:$0xff] }
  0x14   : > { %v331_v31 = vmul.f32 1.442695, %v320_v23  ;;  %v329_v32 = vmul.f32 1.442695, %v319_v24  ;;  %v322_v33 = vmul.f32 14.285714, %v285_v25 }
  0x15   : > { %707 = vpow2.f32 %v327_v26  ;;  %v441_v34 = vsel %vm433_vm3, 0.0, %v282_v21  ;;  %v321_v35 = vmul.f32 14.285714, %v284_v30  ;;  %v287_v40 = vld [vmem:[%s826_s25 + $0x38] sm:$0xff]  ;;  %v444_v41 = vsel %vm436_vm4, 0.0, %v285_v25  ;;  %v286_v44 = vld [vmem:[%s826_s25 + $0x30] sm:$0xff] }
  0x16   : > { %709 = vpow2.f32 %v325_v27  ;;  %451 = vadd.xlane.f32.xlu0 %v441_v34  ;;  %v518_v36 = vadd.f32 %v517_v28, %v441_v34  ;;  %v335_v38 = vmul.f32 1.442695, %v322_v33  ;;  %v443_v42 = vsel %vm435_vm5, 0.0, %v284_v30  ;;  %v288_v37 = vld [vmem:[%s906_s9] sm:$0xff] }
  0x17   : > { %711 = vpow2.f32 %v331_v31  ;;  %453 = vadd.xlane.f32.xlu1 %v442_v29  ;;  %v333_v39 = vmul.f32 1.442695, %v321_v35  ;;  %v324_v46 = vmul.f32 14.285714, %v287_v40  ;;  %v323_v48 = vmul.f32 14.285714, %v286_v44 }
  0x18   : > { %713 = vpow2.f32 %v329_v32  ;;  %v519_v43 = vadd.f32 %v518_v36, %v442_v29  ;;  %v445_v56 = vsel %vm437_vm14, 0.0, %v286_v44  ;;  %vm346_vm0 = vcmp.lt.s32.totalorder %v846_v17, 8 }
  0x19   : > { %715 = vpow2.f32 %v333_v39  ;;  %v339_v50 = vmul.f32 1.442695, %v324_v46  ;;  %v337_v52 = vmul.f32 1.442695, %v323_v48  ;;  %v446_v63 = vsel %vm438_vm13, 0.0, %v287_v40  ;;  %vm370_vm3 = vmand %vm341_vm6, %vm346_vm0  ;;  %v291_v46 = vld [vmem:[%s906_s9 + $0x18] sm:$0xff] }
  0x1a   : > { %455 = vadd.xlane.f32.xlu0 %v443_v42  ;;  %v520_v45 = vadd.f32 %v519_v43, %v443_v42  ;;  %717 = vpow2.f32 %v335_v38  ;;  %vm347_vm2 = vcmp.lt.s32.totalorder %v843_v16, 8  ;;  %vm348_vm4 = vcmp.lt.s32.totalorder %v315_v51, 8  ;;  %v289_v38 = vld [vmem:[%s906_s9 + $0x8] sm:$0xff] }
  0x1b   : > { %457 = vadd.xlane.f32.xlu1 %v444_v41  ;;  %719 = vpow2.f32 %v337_v52  ;;  %vm371_vm5 = vmand %vm341_vm6, %vm347_vm2  ;;  %v463_v42 = vsub.f32 1.0, %v288_v37  ;;  %v464_v44 = vsub.f32 1.0, %v289_v38  ;;  %v466_v52 = vsub.f32 1.0, %v291_v46 }
  0x1c   : > { %v521_v53 = vadd.f32 %v520_v45, %v444_v41  ;;  %721 = vpow2.f32 %v339_v50  ;;  %vm372_vm8 = vmand %vm341_vm6, %vm348_vm4  ;;  %v290_v45 = vld [vmem:[%s906_s9 + $0x10] sm:$0xff]  ;;  %vm422_vm6 = vcmask 7168  }
  0x1d   : > { %v465_v50 = vsub.f32 1.0, %v290_v45 }
  0x1e   : > { %v522_v60 = vadd.f32 %v521_v53, %v445_v56  ;;  %v292_v53 = vld [vmem:[%s906_s9 + $0x20] sm:$0xff] }
  0x1f   : > { %v708_v54 = vpop.eup %707 }
  0x20   : > { %v710_v55 = vpop.eup %709  ;;  %v375_v59 = vsel %vm367_vm11, %v708_v54, 0.0  ;;  %v523_v1 = vadd.f32 %v522_v60, %v446_v63  ;;  %v293_v54 = vld [vmem:[%s906_s9 + $0x28] sm:$0xff]  ;;  %v467_v60 = vsub.f32 1.0, %v292_v53 }
  0x21   : > { %v712_v57 = vpop.eup %711  ;;  %v374_v58 = vsel %vm366_vm10, %v710_v55, 0.0 }
  0x22   : > { %v714_v61 = vpop.eup %713  ;;  %382 = vadd.xlane.f32.xlu0 %v374_v58  ;;  %v503_v62 = vadd.f32 %v375_v59, %v374_v58  ;;  %v377_v5 = vsel %vm369_vm1, %v712_v57, 0.0  ;;  %v524_v6 = vrot.slane %v523_v1, 4 }
  0x23   : > { %v376_v0 = vsel %vm368_vm15, %v714_v61, 0.0  ;;  %v716_v3 = vpop.eup %715 }
  0x24   : > { %386 = vadd.xlane.f32.xlu1 %v376_v0  ;;  %v504_v4 = vadd.f32 %v503_v62, %v376_v0  ;;  %v718_v7 = vpop.eup %717  ;;  %v378_v9 = vsel %vm370_vm3, %v716_v3, 0.0  ;;  %v525_v10 = vadd.f32 %v524_v6, %v523_v1 }
  0x25   : > { %v720_v12 = vpop.eup %719  ;;  %v379_v13 = vsel %vm371_vm5, %v718_v7, 0.0 }
  0x26   : > { %384 = vadd.xlane.f32.xlu0 %v375_v59  ;;  %v505_v8 = vadd.f32 %v504_v4, %v377_v5  ;;  %v526_v14 = vrot.slane %v525_v10, 2  ;;  %v722_v15 = vpop.eup %721  ;;  %v380_v17 = vsel %vm372_vm8, %v720_v12, 0.0 }
  0x27   : > { %v381_v20 = vsel %vm373_vm9, %v722_v15, 0.0 }
  0x28   : > { %388 = vadd.xlane.f32.xlu1 %v377_v5  ;;  %v506_v11 = vadd.f32 %v505_v8, %v378_v9  ;;  %v527_v18 = vadd.f32 %v526_v14, %v525_v10 }
  0x2a   : > { %390 = vadd.xlane.f32.xlu0 %v378_v9  ;;  %v507_v16 = vadd.f32 %v506_v11, %v379_v13  ;;  %v528_v21 = vrot.slane %v527_v18, 1 }
  0x2c   : > { %392 = vadd.xlane.f32.xlu1 %v379_v13  ;;  %v508_v19 = vadd.f32 %v507_v16, %v380_v17  ;;  %v529_v23 = vadd.f32 %v528_v21, %v527_v18 }
  0x2e   : > { %394 = vadd.xlane.f32.xlu0 %v380_v17  ;;  %v509_v22 = vadd.f32 %v508_v19, %v381_v20  ;;  %530 = vst [vmem:[%s279_s28] sm:$0x1] %v529_v23 }
  0x30   : > { %396 = vadd.xlane.f32.xlu1 %v381_v20  ;;  %v510_v24 = vrot.slane %v509_v22, 4 }
  0x32   : > { %v511_v2 = vadd.f32 %v510_v24, %v509_v22  ;;  %459 = vadd.xlane.f32.xlu0 %v445_v56 }
  0x34   : > { %v512_v25 = vrot.slane %v511_v2, 2  ;;  %461 = vadd.xlane.f32.xlu1 %v446_v63  ;;  %v468_v63 = vsub.f32 1.0, %v293_v54 }
  0x36   : > { %v513_v26 = vadd.f32 %v512_v25, %v511_v2 }
  0x38   : > { %v514_v27 = vrot.slane %v513_v26, 1 }
  0x3a   : > { %v515_v28 = vadd.f32 %v514_v27, %v513_v26 }
  0x3c   : > { %516 = vst [vmem:[%s276_s6] sm:$0x1] %v515_v28 }
  0x9f   : > { %v448_v29 = vpop.xlane.xlu0 %447 }
  0xa0   : > { %v450_v30 = vpop.xlane.xlu1 %449  ;;  %v471_v31 = vadd.f32 1e-06, %v448_v29 }
  0xa1   : > { %v472_v32 = vadd.f32 1e-06, %v450_v30 }
  0xa2   : > { %723 = vrcp.f32 %v471_v31 }
  0xa3   : > { %725 = vrcp.f32 %v472_v32  ;;  %v452_v33 = vpop.xlane.xlu0 %451  ;;  %v294_v32 = vld [vmem:[%s906_s9 + $0x30] sm:$0xff] }
  0xa4   : > { %v454_v34 = vpop.xlane.xlu1 %453  ;;  %v473_v35 = vadd.f32 1e-06, %v452_v33  ;;  %v469_v37 = vsub.f32 1.0, %v294_v32 }
  0xa5   : > { %v474_v36 = vadd.f32 1e-06, %v454_v34 }
  0xa6   : > { %727 = vrcp.f32 %v473_v35  ;;  %v295_v35 = vld [vmem:[%s906_s9 + $0x38] sm:$0xff] }
  0xa7   : > { %729 = vrcp.f32 %v474_v36  ;;  %v456_v39 = vpop.xlane.xlu0 %455 }
  0xa8   : > { %v458_v40 = vpop.xlane.xlu1 %457  ;;  %v475_v41 = vadd.f32 1e-06, %v456_v39 }
  0xa9   : > { %v476_v43 = vadd.f32 1e-06, %v458_v40  ;;  %v470_v40 = vsub.f32 1.0, %v295_v35 }
  0xaa   : > { %731 = vrcp.f32 %v475_v41 }
  0xab   : > { %733 = vrcp.f32 %v476_v43 }
  0xac   : > { %v724_v47 = vpop.eup %723 }
  0xad   : > { %v726_v48 = vpop.eup %725  ;;  %v480_v49 = vmul.f32 %v724_v47, %v463_v42 }
  0xae   : > { %v482_v51 = vmul.f32 %v726_v48, %v464_v44 }
  0xaf   : > { %495 = vst.msk [vmem:[%s916_s12] sm:$0xff] %vm422_vm6, %v480_v49  ;;  %v383_v55 = vpop.xlane.xlu0 %382 }
  0xb0   : > { %v728_v56 = vpop.eup %727  ;;  %496 = vst.msk [vmem:[%s916_s12 + $0x8] sm:$0xff] %vm422_vm6, %v482_v51  ;;  %v398_v57 = vmax.f32 %v383_v55, 1e-30 }
  0xb1   : > { %v730_v58 = vpop.eup %729  ;;  %v484_v59 = vmul.f32 %v728_v56, %v465_v50  ;;  %v387_v61 = vpop.xlane.xlu1 %386 }
  0xb2   : > { %v486_v62 = vmul.f32 %v730_v58, %v466_v52  ;;  %v400_v0 = vmax.f32 %v387_v61, 1e-30  ;;  %735 = vlog2.f32 %v398_v57 }
  0xb3   : > { %497 = vst.msk [vmem:[%s916_s12 + $0x10] sm:$0xff] %vm422_vm6, %v484_v59  ;;  %v385_v1 = vpop.xlane.xlu0 %384 }
  0xb4   : > { %v732_v3 = vpop.eup %731  ;;  %498 = vst.msk [vmem:[%s916_s12 + $0x18] sm:$0xff] %vm422_vm6, %v486_v62  ;;  %737 = vlog2.f32 %v400_v0  ;;  %v399_v4 = vmax.f32 %v385_v1, 1e-30 }
  0xb5   : > { %v734_v5 = vpop.eup %733  ;;  %v488_v6 = vmul.f32 %v732_v3, %v467_v60  ;;  %v389_v7 = vpop.xlane.xlu1 %388 }
  0xb6   : > { %v490_v8 = vmul.f32 %v734_v5, %v468_v63  ;;  %v401_v9 = vmax.f32 %v389_v7, 1e-30  ;;  %739 = vlog2.f32 %v399_v4 }
  0xb7   : > { %499 = vst.msk [vmem:[%s916_s12 + $0x20] sm:$0xff] %vm422_vm6, %v488_v6  ;;  %v391_v10 = vpop.xlane.xlu0 %390 }
  0xb8   : > { %500 = vst.msk [vmem:[%s916_s12 + $0x28] sm:$0xff] %vm422_vm6, %v490_v8  ;;  %741 = vlog2.f32 %v401_v9  ;;  %v402_v11 = vmax.f32 %v391_v10, 1e-30 }
  0xb9   : > { %v393_v12 = vpop.xlane.xlu1 %392 }
  0xba   : > { %v403_v13 = vmax.f32 %v393_v12, 1e-30  ;;  %743 = vlog2.f32 %v402_v11 }
  0xbb   : > { %v395_v14 = vpop.xlane.xlu0 %394 }
  0xbc   : > { %v736_v15 = vpop.eup %735  ;;  %745 = vlog2.f32 %v403_v13  ;;  %v404_v16 = vmax.f32 %v395_v14, 1e-30 }
  0xbd   : > { %v407_v17 = vmul.f32 0.6931472, %v736_v15  ;;  %v397_v18 = vpop.xlane.xlu1 %396 }
  0xbe   : > { %v738_v19 = vpop.eup %737  ;;  %v405_v20 = vmax.f32 %v397_v18, 1e-30  ;;  %747 = vlog2.f32 %v404_v16 }
  0xbf   : > { %v411_v21 = vmul.f32 0.6931472, %v738_v19  ;;  %423 = vst.msk [vmem:[%s936_s15] sm:$0xff] %vm422_vm6, %v407_v17  ;;  %v460_v22 = vpop.xlane.xlu0 %459 }
  0xc0   : > { %v740_v23 = vpop.eup %739  ;;  %749 = vlog2.f32 %v405_v20  ;;  %v477_v24 = vadd.f32 1e-06, %v460_v22 }
  0xc1   : > { %425 = vst.msk [vmem:[%s936_s15 + $0x10] sm:$0xff] %vm422_vm6, %v411_v21  ;;  %v409_v2 = vmul.f32 0.6931472, %v740_v23  ;;  %v462_v25 = vpop.xlane.xlu1 %461 }
  0xc2   : > { %v742_v26 = vpop.eup %741  ;;  %v478_v27 = vadd.f32 1e-06, %v462_v25  ;;  %751 = vrcp.f32 %v477_v24 }
  0xc3   : > { %v413_v28 = vmul.f32 0.6931472, %v742_v26  ;;  %424 = vst.msk [vmem:[%s936_s15 + $0x8] sm:$0xff] %vm422_vm6, %v409_v2 }
  0xc4   : > { %v744_v29 = vpop.eup %743  ;;  %753 = vrcp.f32 %v478_v27 }
  0xc5   : > { %426 = vst.msk [vmem:[%s936_s15 + $0x18] sm:$0xff] %vm422_vm6, %v413_v28  ;;  %v415_v30 = vmul.f32 0.6931472, %v744_v29 }
  0xc6   : > { %v746_v31 = vpop.eup %745 }
  0xc7   : > { %v417_v33 = vmul.f32 0.6931472, %v746_v31  ;;  %427 = vst.msk [vmem:[%s936_s15 + $0x20] sm:$0xff] %vm422_vm6, %v415_v30 }
  0xc8   : > { %v748_v34 = vpop.eup %747 }
  0xc9   : > { %428 = vst.msk [vmem:[%s936_s15 + $0x28] sm:$0xff] %vm422_vm6, %v417_v33  ;;  %v419_v36 = vmul.f32 0.6931472, %v748_v34 }
  0xca   : > { %v750_v38 = vpop.eup %749 }
  0xcb   : > { %v421_v39 = vmul.f32 0.6931472, %v750_v38  ;;  %429 = vst.msk [vmem:[%s936_s15 + $0x30] sm:$0xff] %vm422_vm6, %v419_v36 }
  0xcc   : > { %v752_v41 = vpop.eup %751 }
  0xcd   : > { %430 = vst.msk [vmem:[%s936_s15 + $0x38] sm:$0xff] %vm422_vm6, %v421_v39  ;;  %v492_v42 = vmul.f32 %v752_v41, %v469_v37 }
  0xce   : > { %v754_v43 = vpop.eup %753 }
  0xcf   : > { %v494_v44 = vmul.f32 %v754_v43, %v470_v40  ;;  %501 = vst.msk [vmem:[%s916_s12 + $0x30] sm:$0xff] %vm422_vm6, %v492_v42 }
  0xd1   : > { %502 = vst.msk [vmem:[%s916_s12 + $0x38] sm:$0xff] %vm422_vm6, %v494_v44 }
  0xd2 PF: > { %s16_s18 = sadd.s32 1, %s761_s18  }
  0xd3   : > { %p13_p5 = scmp.ge.s32.totalorder %s16_s18, 4  }
  0xd5   :  { %15 = sbr.rel (!%p13_p5) target bundleno = 1 (0x1), region = 97 }

// kernel: infonce_loss.3
= control target key start
LH: loop header
LB: loop body
LE: loop exit
PB: predicated region body
PF: predicated region fallthrough
CT: control target
= control target key end

     0   :  { %s937_s27 = smov 0   ;;  %s1242_s0 = inlined_call_operand.vmem [shape: f32[128,128], index: 0, kind: input, shape index: {}]   ;;  %s1243_s1 = inlined_call_operand.vmem [shape: f32[128,1], index: 1, kind: input, shape index: {}]   ;;  %s1244_s2 = inlined_call_operand.vmem [shape: f32[128,1], index: 2, kind: input, shape index: {}]   ;;  %s1245_s3 = inlined_call_operand.vmem [shape: f32[1,128], index: 3, kind: input, shape index: {}]   ;;  %s1246_s4 = inlined_call_operand.vmem [shape: f32[1,128], index: 4, kind: input, shape index: {}]   ;;  %s1247_s5 = inlined_call_operand.vmem [shape: f32[1,128], index: 5, kind: input, shape index: {}]   ;;  %s1248_s6 = inlined_call_operand.vmem [shape: f32[128,1], index: 6, kind: output, shape index: {0}]   ;;  %s1249_s7 = inlined_call_operand.vmem [shape: f32[128,1], index: 7, kind: output, shape index: {1}]   ;;  %s1250_s8 = inlined_call_operand.vmem [shape: f32[2,1,128], index: 8, kind: output, shape index: {2}]  }
   0x1 LB: > { %s943_s28 = sadd.s32 4294967295, %s889_s27   ;;  %p855_p0 = scmp.ge.s32.totalorder %s889_s27, 1  ;;  %s889_s27 = sphi %s937_s27, %s19_s27  }
   0x2   : > { %p290_p1 = scmp.lt.s32.totalorder %s889_s27, 3 }
   0x4   : > { %p291_p2 = pnand %p855_p0, %p290_p1 }
   0x5   : > { %s856_s29 = sshll.u32 (!%p291_p2), %s943_s28, 3  ;;  %v891_v0 = vmov (!%p291_p2), 0   ;;  %v462_v17 = vlaneseq (!%p291_p2)  ;;  %s867_s15 = sshll.u32 (!%p291_p2), %s943_s28, 6  ;;  %v979_v32 = vld [vmem:[%s1246_s4] ss:$0 sm:$0xff] (!%p291_p2)  ;;  %vm610_vm8 = vcmask (!%p291_p2), 7168  }
   0x6   : > { %294 = sbr.rel (%p291_p2) target bundleno = 326 (0x146), region = 44  ;;  %882 = vset.pattern.permute.xlu1 (!%p291_p2), %v891_v0  ;;  %881 = vset.pattern.permute.xlu0 (!%p291_p2), %v891_v0  ;;  %p343_p3 = scmp.lt.s32.totalorder (!%p291_p2), %s856_s29, 15  ;;  %v474_v19 = vstv (!%p291_p2), %s867_s15  ;;  %v1003_v44 = vld [vmem:[%s1247_s5] ss:$0 sm:$0xff] (!%p291_p2) }
   0x7   : > { %v466_v18 = vshrl.u32 (!%p291_p2), %v462_v17, 7  ;;  %v959_v23 = vand.u32 (!%p291_p2), 127, %v462_v17  ;;  %p372_p4 = scmp.lt.s32.totalorder (!%p291_p2), %s943_s28, 1 }
   0x9   : > { %v468_v20 = vadd.s32 (!%p291_p2), 16, %v466_v18  ;;  %v469_v21 = vadd.s32 (!%p291_p2), 24, %v466_v18  ;;  %v467_v22 = vadd.s32 (!%p291_p2), 8, %v466_v18  ;;  %v475_v24 = vadd.s32 (!%p291_p2), %v474_v19, %v466_v18 }
   0xa   : > { %v471_v28 = vadd.s32 (!%p291_p2), 40, %v466_v18  ;;  %v470_v30 = vadd.s32 (!%p291_p2), 32, %v466_v18  ;;  %v473_v37 = vadd.s32 (!%p291_p2), 56, %v466_v18  ;;  %v472_v39 = vadd.s32 (!%p291_p2), 48, %v466_v18 }
   0xb   : > { %v477_v25 = vadd.s32 (!%p291_p2), %v474_v19, %v468_v20  ;;  %v478_v26 = vadd.s32 (!%p291_p2), %v474_v19, %v469_v21  ;;  %v476_v27 = vadd.s32 (!%p291_p2), %v474_v19, %v467_v22  ;;  %vm483_vm0 = vcmp.eq.s32.totalorder (!%p291_p2), %v959_v23, %v475_v24 }
   0xc   : > { %v480_v36 = vadd.s32 (!%p291_p2), %v474_v19, %v471_v28  ;;  %v989_v38 = vadd.s32 (!%p291_p2), %v474_v19, %v470_v30  ;;  %v1009_v46 = vadd.s32 (!%p291_p2), %v474_v19, %v473_v37  ;;  %v1022_v52 = vadd.s32 (!%p291_p2), %v474_v19, %v472_v39 }
   0xd   : > { %s1252_s29 = smov (!%p343_p3, %s856_s29), 15  ;;  %vm485_vm1 = vcmp.eq.s32.totalorder %v959_v23, %v477_v25  ;;  %vm486_vm2 = vcmp.eq.s32.totalorder %v959_v23, %v478_v26  ;;  %vm484_vm3 = vcmp.eq.s32.totalorder %v959_v23, %v476_v27  ;;  %v1035_v57 = vsel %vm483_vm0, %v1003_v44, 0.0  ;;  %s1254_s28 = smov (!%p372_p4, %s943_s28), 1 }
   0xe   : > { %s948_s30 = sshll.u32 %s1252_s29, 3  ;;  %vm488_vm4 = vcmp.eq.s32.totalorder %v959_v23, %v480_v36  ;;  %v1014_v47 = vsel %vm485_vm1, %v1003_v44, 0.0  ;;  %vm487_vm5 = vcmp.eq.s32.totalorder %v959_v23, %v989_v38  ;;  %v1040_v59 = vsel %vm486_vm2, %v1003_v44, 0.0  ;;  %s374_s29 = scalar_lea.vmem %s1250_s8, %s1254_s28 }
   0xf   : > { %s358_s11 = scalar_lea.vmem %s1244_s2, %s948_s30  ;;  %s352_s14 = scalar_lea.vmem %s1243_s1, %s948_s30  ;;  %v1049_v62 = vsel %vm484_vm3, %v1003_v44, 0.0  ;;  %vm490_vm6 = vcmp.eq.s32.totalorder %v959_v23, %v1009_v46  ;;  %vm489_vm7 = vcmp.eq.s32.totalorder %v959_v23, %v1022_v52 }
  0x10   : > { %v501_v1 = vld [vmem:[%s358_s11 + $0x10] sm:$0xff]  ;;  %v499_v2 = vld [vmem:[%s358_s11] sm:$0xff]  ;;  %v502_v3 = vld [vmem:[%s358_s11 + $0x18] sm:$0xff]  ;;  %s965_s18 = scalar_lea.vmem %s1242_s0, %s948_s30  ;;  %s364_s13 = scalar_lea.vmem %s1248_s6, %s948_s30 }
  0x11   : > { %519 = vperm.xlu1 %882, %v501_v1   ;;  %509 = vperm.xlu0 %881, %v499_v2   ;;  %v500_v4 = vld [vmem:[%s358_s11 + $0x8] sm:$0xff]  ;;  %v503_v6 = vld [vmem:[%s358_s11 + $0x20] sm:$0xff]  ;;  %v506_v7 = vld [vmem:[%s358_s11 + $0x38] sm:$0xff] }
  0x12   : > { %v504_v5 = vld [vmem:[%s358_s11 + $0x28] sm:$0xff]  ;;  %v505_v8 = vld [vmem:[%s358_s11 + $0x30] sm:$0xff]  ;;  %v391_v10 = vld [vmem:[%s352_s14] sm:$0xff]  ;;  %s370_s11 = scalar_lea.vmem %s1249_s7, %s948_s30 }
  0x13   : > { %v392_v9 = vld [vmem:[%s352_s14 + $0x8] sm:$0xff]  ;;  %v394_v11 = vld [vmem:[%s352_s14 + $0x18] sm:$0xff]  ;;  %v393_v12 = vld [vmem:[%s352_s14 + $0x10] sm:$0xff] }
  0x14   : > { %v396_v13 = vld [vmem:[%s352_s14 + $0x28] sm:$0xff]  ;;  %v395_v14 = vld [vmem:[%s352_s14 + $0x20] sm:$0xff]  ;;  %v398_v15 = vld [vmem:[%s352_s14 + $0x38] sm:$0xff] }
  0x15   : > { %524 = vperm.xlu1 %882, %v502_v3   ;;  %514 = vperm.xlu0 %881, %v500_v4   ;;  %v397_v16 = vld [vmem:[%s352_s14 + $0x30] sm:$0xff]  ;;  %v969_v29 = vld [vmem:[%s965_s18] sm:$0xff]  ;;  %v985_v34 = vld [vmem:[%s965_s18 + $0x18] sm:$0xff] }
  0x16   : > { %v973_v31 = vld [vmem:[%s965_s18 + $0x10] sm:$0xff]  ;;  %v491_v33 = vsel %vm483_vm0, 0.0, %v969_v29  ;;  %v376_v35 = vld [vmem:[%s965_s18 + $0x8] sm:$0xff]  ;;  %v494_v42 = vsel %vm486_vm2, 0.0, %v985_v34  ;;  %v1020_v51 = vld [vmem:[%s965_s18 + $0x20] sm:$0xff] }
  0x17   : > { %v493_v40 = vsel %vm485_vm1, 0.0, %v973_v31  ;;  %v562_v41 = vmul.f32 %v979_v32, %v491_v33  ;;  %v492_v43 = vsel %vm484_vm3, 0.0, %v376_v35  ;;  %v1007_v45 = vld [vmem:[%s965_s18 + $0x28] sm:$0xff]  ;;  %v1029_v55 = vmul.f32 %v979_v32, %v494_v42  ;;  %v1058_v0 = vld [vmem:[%s965_s18 + $0x38] sm:$0xff] }
  0x18   : > { %v564_v49 = vmul.f32 %v979_v32, %v493_v40  ;;  %v563_v56 = vmul.f32 %v979_v32, %v492_v43  ;;  %v496_v60 = vsel %vm488_vm4, 0.0, %v1007_v45  ;;  %v495_v63 = vsel %vm487_vm5, 0.0, %v1020_v51 }
  0x19   : > { %534 = vperm.xlu1 %882, %v504_v5   ;;  %529 = vperm.xlu0 %881, %v503_v6   ;;  %v578_v58 = vmax.f32 %v562_v41, 0.0  ;;  %v1064_v5 = vsel %vm488_vm4, %v1003_v44, 0.0  ;;  %v1069_v6 = vld [vmem:[%s965_s18 + $0x30] sm:$0xff]  ;;  %v1103_v24 = vmul.f32 14.285714, %v376_v35 }
  0x1a   : > { %v580_v2 = vmax.f32 %v564_v49, 0.0  ;;  %v497_v18 = vsel %vm489_vm7, 0.0, %v1069_v6  ;;  %v383_v25 = vmul.f32 14.285714, %v969_v29  ;;  %v386_v38 = vmul.f32 14.285714, %v985_v34 }
  0x1b   : > { %v568_v39 = vmul.f32 %v979_v32, %v497_v18 }
  0x1d   : > { %544 = vperm.xlu1 %882, %v506_v7   ;;  %539 = vperm.xlu0 %881, %v505_v8   ;;  %v581_v7 = vmax.f32 %v1029_v55, 0.0 }
  0x1f   : > { %v1096_v19 = vadd.f32 %v1040_v59, %v581_v7 }
  0x21   : > { %406 = vperm.xlu1 %882, %v392_v9   ;;  %401 = vperm.xlu0 %881, %v391_v10   ;;  %v579_v9 = vmax.f32 %v563_v56, 0.0  ;;  %v567_v10 = vmul.f32 %v979_v32, %v496_v60 }
  0x23   : > { %v583_v27 = vmax.f32 %v567_v10, 0.0  ;;  %v665_v29 = vadd.f32 %v1049_v62, %v579_v9  ;;  %v387_v10 = vmul.f32 14.285714, %v1020_v51 }
  0x25   : > { %416 = vperm.xlu1 %882, %v394_v11   ;;  %411 = vperm.xlu0 %881, %v393_v12  }
  0x29   : > { %426 = vperm.xlu1 %882, %v396_v13   ;;  %421 = vperm.xlu0 %881, %v395_v14   ;;  %v566_v13 = vmul.f32 %v979_v32, %v495_v63  ;;  %v498_v14 = vsel %vm490_vm6, 0.0, %v1058_v0 }
  0x2a   : > { %v1111_v30 = vmul.f32 %v979_v32, %v498_v14 }
  0x2b   : > { %v582_v37 = vmax.f32 %v566_v13, 0.0  ;;  %v1158_v13 = vsel %vm490_vm6, %v1003_v44, 0.0 }
  0x2c   : > { %v585_v56 = vmax.f32 %v1111_v30, 0.0 }
  0x2d   : > { %436 = vperm.xlu1 %882, %v398_v15   ;;  %431 = vperm.xlu0 %881, %v397_v16   ;;  %v1087_v15 = vadd.f32 %v1014_v47, %v580_v2  ;;  %v664_v16 = vadd.f32 %v1035_v57, %v578_v58 }
  0x90   : > { %v520_v48 = vpop.permute.xlu1 %519  ;;  %v510_v50 = vpop.permute.xlu0 %509 }
  0x91   : > { %v1024_v53 = vmul.f32 %v520_v48, %v493_v40  ;;  %v1026_v54 = vmul.f32 %v510_v50, %v491_v33  ;;  %v1116_v33 = vld [vmem:[%s1245_s3] ss:$0 sm:$0xff]  ;;  %v1131_v48 = vsel %vm487_vm5, %v1003_v44, 0.0 }
  0x92   : > { %v455_v50 = vsub.f32 %v1116_v33, %v1103_v24  ;;  %v454_v55 = vsub.f32 %v1116_v33, %v383_v25  ;;  %v668_v34 = vadd.f32 %v1131_v48, %v582_v37 }
  0x93   : > { %v570_v61 = vmax.f32 %v1026_v54, 0.0  ;;  %v572_v1 = vmax.f32 %v1024_v53, 0.0  ;;  %v388_v54 = vmul.f32 14.285714, %v1007_v45 }
  0x94   : > { %v525_v3 = vpop.permute.xlu1 %524  ;;  %v515_v4 = vpop.permute.xlu0 %514 }
  0x95   : > { %v1072_v8 = vmul.f32 %v515_v4, %v492_v43  ;;  %v1075_v11 = vmul.f32 %v525_v3, %v494_v42  ;;  %v1079_v12 = vadd.f32 %v578_v58, %v570_v61  ;;  %v1101_v22 = vadd.f32 %v580_v2, %v572_v1 }
  0x96   : > { %v385_v42 = vmul.f32 14.285714, %v973_v31  ;;  %v1125_v43 = vadd.f32 %v1064_v5, %v583_v27  ;;  %v650_v45 = vadd.f32 %v1014_v47, %v572_v1 }
  0x97   : > { %v571_v17 = vmax.f32 %v1072_v8, 0.0  ;;  %594 = vmax.xlane.f32.xlu0 %v1079_v12  ;;  %v573_v36 = vmax.f32 %v1075_v11, 0.0 }
  0x98   : > { %v535_v20 = vpop.permute.xlu1 %534  ;;  %v530_v21 = vpop.permute.xlu0 %529 }
  0x99   : > { %v1106_v26 = vmul.f32 %v535_v20, %v496_v60  ;;  %v1108_v28 = vmul.f32 %v530_v21, %v495_v63  ;;  %v587_v35 = vadd.f32 %v579_v9, %v571_v17  ;;  %v584_v60 = vmax.f32 %v568_v39, 0.0 }
  0x9a   : > { %v589_v2 = vadd.f32 %v581_v7, %v573_v36  ;;  %v456_v9 = vsub.f32 %v1116_v33, %v385_v42  ;;  %v673_v20 = vmul.f32 %v665_v29, %v455_v50  ;;  %v648_v21 = vadd.f32 %v1035_v57, %v570_v61 }
  0x9b   : > { %v575_v40 = vmax.f32 %v1106_v26, 0.0  ;;  %v574_v41 = vmax.f32 %v1108_v28, 0.0  ;;  %596 = vmax.xlane.f32.xlu1 %v587_v35  ;;  %598 = vmax.xlane.f32.xlu0 %v1101_v22  ;;  %v458_v57 = vsub.f32 %v1116_v33, %v387_v10  ;;  %v651_v53 = vadd.f32 %v1040_v59, %v573_v36 }
  0x9c   : > { %v545_v32 = vpop.permute.xlu1 %544  ;;  %v540_v49 = vpop.permute.xlu0 %539  ;;  %v674_v61 = vmul.f32 %v1087_v15, %v456_v9 }
  0x9d   : > { %v1137_v31 = vmul.f32 %v545_v32, %v498_v14  ;;  %v1140_v58 = vmul.f32 %v540_v49, %v497_v18  ;;  %v590_v63 = vadd.f32 %v582_v37, %v574_v41  ;;  %v591_v3 = vadd.f32 %v583_v27, %v575_v40 }
  0x9e   : > { %v672_v18 = vmul.f32 %v664_v16, %v454_v55  ;;  %v457_v37 = vsub.f32 %v1116_v33, %v386_v38  ;;  %v653_v28 = vadd.f32 %v1064_v5, %v575_v40 }
  0x9f   : > { %v577_v4 = vmax.f32 %v1137_v31, 0.0  ;;  %v576_v8 = vmax.f32 %v1140_v58, 0.0  ;;  %602 = vmax.xlane.f32.xlu1 %v590_v63  ;;  %600 = vmax.xlane.f32.xlu0 %v589_v2  ;;  %v619_v51 = vmax.f32 %v1079_v12, %v590_v63  ;;  %v620_v32 = vmax.f32 %v587_v35, %v591_v3 }
  0xa0   : > { %v407_v7 = vpop.permute.xlu1 %406  ;;  %v402_v14 = vpop.permute.xlu0 %401  ;;  %v649_v12 = vadd.f32 %v1049_v62, %v571_v17  ;;  %v389_v62 = vmul.f32 14.285714, %v1069_v6 }
  0xa1   : > { %v439_v27 = vsub.f32 %v402_v14, %v383_v25  ;;  %v440_v39 = vsub.f32 %v407_v7, %v1103_v24  ;;  %v592_v46 = vadd.f32 %v584_v60, %v576_v8  ;;  %v593_v16 = vadd.f32 %v585_v56, %v577_v4 }
  0xa2   : > { %v646_v24 = vsel %vm489_vm7, %v1003_v44, 0.0  ;;  %v623_v63 = vmax.f32 %v619_v51, %v620_v32  ;;  %v655_v40 = vadd.f32 %v1158_v13, %v577_v4 }
  0xa3   : > { %v656_v29 = vmul.f32 %v648_v21, %v439_v27  ;;  %v621_v25 = vmax.f32 %v1101_v22, %v592_v46  ;;  %606 = vmax.xlane.f32.xlu1 %v592_v46  ;;  %604 = vmax.xlane.f32.xlu0 %v591_v3  ;;  %v622_v50 = vmax.f32 %v589_v2, %v593_v16 }
  0xa4   : > { %v417_v35 = vpop.permute.xlu1 %416  ;;  %v412_v49 = vpop.permute.xlu0 %411  ;;  %v657_v17 = vmul.f32 %v649_v12, %v440_v39  ;;  %v670_v44 = vadd.f32 %v646_v24, %v584_v60  ;;  %v459_v22 = vsub.f32 %v1116_v33, %v388_v54  ;;  %v675_v3 = vmul.f32 %v1096_v19, %v457_v37 }
  0xa5   : > { %v441_v55 = vsub.f32 %v412_v49, %v385_v42  ;;  %v680_v15 = vadd.f32 %v672_v18, %v656_v29  ;;  %v442_v9 = vsub.f32 %v417_v35, %v386_v38  ;;  %v624_v23 = vmax.f32 %v621_v25, %v622_v50 }
  0xa6   : > { %v390_v42 = vmul.f32 14.285714, %v1058_v0  ;;  %v676_v38 = vmul.f32 %v668_v34, %v458_v57  ;;  %v652_v60 = vadd.f32 %v1131_v48, %v574_v41  ;;  %v460_v19 = vsub.f32 %v1116_v33, %v389_v62 }
  0xa7   : > { %v658_v52 = vmul.f32 %v650_v45, %v441_v55  ;;  %608 = vmax.xlane.f32.xlu0 %v593_v16  ;;  %v625_v47 = vmax.f32 %v623_v63, %v624_v23  ;;  %688 = vadd.xlane.f32.xlu1 %v680_v15  ;;  %v659_v11 = vmul.f32 %v651_v53, %v442_v9 }
  0xa8   : > { %v427_v1 = vpop.permute.xlu1 %426  ;;  %v422_v6 = vpop.permute.xlu0 %421  ;;  %v681_v36 = vadd.f32 %v673_v20, %v657_v17  ;;  %v671_v18 = vadd.f32 %v1158_v13, %v585_v56  ;;  %v677_v0 = vmul.f32 %v1125_v43, %v459_v22  ;;  %v654_v30 = vadd.f32 %v646_v24, %v576_v8 }
  0xa9   : > { %v443_v2 = vsub.f32 %v422_v6, %v387_v10  ;;  %v682_v7 = vadd.f32 %v674_v61, %v658_v52  ;;  %v626_v14 = vrot.slane %v625_v47, 4  ;;  %v444_v59 = vsub.f32 %v427_v1, %v388_v54 }
  0xaa   : > { %v461_v10 = vsub.f32 %v1116_v33, %v390_v42  ;;  %v678_v51 = vmul.f32 %v670_v44, %v460_v19  ;;  %v683_v37 = vadd.f32 %v675_v3, %v659_v11 }
  0xab   : > { %v660_v21 = vmul.f32 %v652_v60, %v443_v2  ;;  %v627_v41 = vmax.f32 %v625_v47, %v626_v14  ;;  %690 = vadd.xlane.f32.xlu0 %v681_v36  ;;  %692 = vadd.xlane.f32.xlu1 %v682_v7  ;;  %v661_v27 = vmul.f32 %v653_v28, %v444_v59 }
  0xac   : > { %v437_v48 = vpop.permute.xlu1 %436  ;;  %v432_v34 = vpop.permute.xlu0 %431  ;;  %v679_v32 = vmul.f32 %v671_v18, %v461_v10 }
  0xad   : > { %v445_v56 = vsub.f32 %v432_v34, %v389_v62  ;;  %v684_v20 = vadd.f32 %v676_v38, %v660_v21  ;;  %v628_v43 = vrot.slane %v627_v41, 2  ;;  %v446_v26 = vsub.f32 %v437_v48, %v390_v42 }
  0xae   : > { %v685_v46 = vadd.f32 %v677_v0, %v661_v27 }
  0xaf   : > { %v662_v5 = vmul.f32 %v654_v30, %v445_v56  ;;  %v629_v33 = vmax.f32 %v627_v41, %v628_v43  ;;  %694 = vadd.xlane.f32.xlu0 %v683_v37  ;;  %696 = vadd.xlane.f32.xlu1 %v684_v20  ;;  %v663_v39 = vmul.f32 %v655_v40, %v446_v26 }
  0xb1   : > { %v686_v58 = vadd.f32 %v678_v51, %v662_v5  ;;  %v630_v8 = vrot.slane %v629_v33, 1  ;;  %v687_v31 = vadd.f32 %v679_v32, %v663_v39 }
  0xb3   : > { %v631_v16 = vmax.f32 %v629_v33, %v630_v8  ;;  %698 = vadd.xlane.f32.xlu0 %v685_v46  ;;  %700 = vadd.xlane.f32.xlu1 %v686_v58 }
  0xb5   : > { %632 = vst [vmem:[%s374_s29] sm:$0x1] %v631_v16 }
  0xb7   : > { %702 = vadd.xlane.f32.xlu0 %v687_v31 }
 0x124   : > { %v595_v4 = vpop.xlane.xlu0 %594 }
 0x125   : > { %611 = vst.msk [vmem:[%s370_s11] sm:$0xff] %vm610_vm8, %v595_v4 }
 0x128   : > { %v597_v13 = vpop.xlane.xlu1 %596  ;;  %v599_v29 = vpop.xlane.xlu0 %598 }
 0x129   : > { %612 = vst.msk [vmem:[%s370_s11 + $0x8] sm:$0xff] %vm610_vm8, %v597_v13  ;;  %613 = vst.msk [vmem:[%s370_s11 + $0x10] sm:$0xff] %vm610_vm8, %v599_v29 }
 0x12c   : > { %v603_v54 = vpop.xlane.xlu1 %602  ;;  %v601_v57 = vpop.xlane.xlu0 %600 }
 0x12d   : > { %615 = vst.msk [vmem:[%s370_s11 + $0x20] sm:$0xff] %vm610_vm8, %v603_v54  ;;  %614 = vst.msk [vmem:[%s370_s11 + $0x18] sm:$0xff] %vm610_vm8, %v601_v57 }
 0x130   : > { %v607_v61 = vpop.xlane.xlu1 %606  ;;  %v605_v12 = vpop.xlane.xlu0 %604 }
 0x131   : > { %617 = vst.msk [vmem:[%s370_s11 + $0x30] sm:$0xff] %vm610_vm8, %v607_v61  ;;  %616 = vst.msk [vmem:[%s370_s11 + $0x28] sm:$0xff] %vm610_vm8, %v605_v12 }
 0x134   : > { %v609_v24 = vpop.xlane.xlu0 %608  ;;  %v689_v25 = vpop.xlane.xlu1 %688 }
 0x135   : > { %618 = vst.msk [vmem:[%s370_s11 + $0x38] sm:$0xff] %vm610_vm8, %v609_v24  ;;  %704 = vst.msk [vmem:[%s364_s13] sm:$0xff] %vm610_vm8, %v689_v25 }
 0x138   : > { %v691_v35 = vpop.xlane.xlu0 %690  ;;  %v693_v49 = vpop.xlane.xlu1 %692 }
 0x139   : > { %705 = vst.msk [vmem:[%s364_s13 + $0x8] sm:$0xff] %vm610_vm8, %v691_v35  ;;  %706 = vst.msk [vmem:[%s364_s13 + $0x10] sm:$0xff] %vm610_vm8, %v693_v49 }
 0x13c   : > { %v695_v50 = vpop.xlane.xlu0 %694  ;;  %v697_v45 = vpop.xlane.xlu1 %696 }
 0x13d   : > { %707 = vst.msk [vmem:[%s364_s13 + $0x18] sm:$0xff] %vm610_vm8, %v695_v50  ;;  %708 = vst.msk [vmem:[%s364_s13 + $0x20] sm:$0xff] %vm610_vm8, %v697_v45 }
 0x140   : > { %v699_v55 = vpop.xlane.xlu0 %698  ;;  %v701_v15 = vpop.xlane.xlu1 %700 }
 0x141   : > { %709 = vst.msk [vmem:[%s364_s13 + $0x28] sm:$0xff] %vm610_vm8, %v699_v55  ;;  %710 = vst.msk [vmem:[%s364_s13 + $0x30] sm:$0xff] %vm610_vm8, %v701_v15 }
 0x144   : > { %v703_v62 = vpop.xlane.xlu0 %702 }
 0x145   : > { %711 = vst.msk [vmem:[%s364_s13 + $0x38] sm:$0xff] %vm610_vm8, %v703_v62 }
 0x146 PF: > { %s19_s27 = sadd.s32 1, %s889_s27  }
 0x147   : > { %p16_p5 = scmp.ge.s32.totalorder %s19_s27, 4  }
 0x149   :  { %18 = sbr.rel (!%p16_p5) target bundleno = 1 (0x1), region = 104 }

</bundles_post_ra>
